<compile_context>
chip_gen: v7x
topology: tpu7x:2x2x1
jax: 0.10.0
libtpu: 0.0.40
codegen_flags: <defaults>
</compile_context>

<pallas_src>
import functools

import jax
import jax.numpy as jnp
from jax.experimental import pallas as pl
from jax.experimental.pallas import tpu as pltpu

LANE = 128


def _round_up(x, m):
    return ((x + m - 1) // m) * m


# ----------------------------- Pallas kernel --------------------------------
def rnn_agent_kernel(
    # activations (batch-tiled)
    inputs_ref, hidden_ref, obs_ref,
    # representation MLP (bf16 weights, f32 biases)
    w_r1_ref, b_r1_ref, w_r2_ref, b_r2_ref, w_r3_ref, b_r3_ref,
    # fc1 split into its two K blocks (inputs part / repre part)
    w1i_ref, w1r_ref, b1_ref,
    # GRU gate weights, single slab: columns [r | z | n] at offsets 0/H/2H
    wi_ref, bi_ref, wh_ref, bh_ref,
    # fc2 (columns padded to 128 lanes so q stores are lane-dense)
    w2_ref, b2_ref,
    # outputs (lane-dense, padded)
    q_ref, h_out_ref,
    *, hidden_dim,
):
    f32 = jnp.float32
    bf16 = jnp.bfloat16
    H = hidden_dim
    HP = h_out_ref.shape[-1]           # padded hidden width (128)
    TB = hidden_ref.shape[0]

    def mm(a_f32, w_ref):
        # bf16 x bf16 MXU matmul with f32 accumulation.
        return jnp.dot(a_f32.astype(bf16), w_ref[...],
                       preferred_element_type=f32)

    # --- representation MLP (torch.no_grad() block; value-identical) --------
    t = jnp.maximum(mm(obs_ref[...], w_r1_ref) + b_r1_ref[...], 0.0)
    t = jnp.maximum(mm(t, w_r2_ref) + b_r2_ref[...], 0.0)
    repre = mm(t, w_r3_ref) + b_r3_ref[...]                    # (TB, repre_dim)

    # --- fc1 on concat([inputs, repre]) == two tight dots -> ReLU ------------
    x = mm(inputs_ref[...], w1i_ref) + mm(repre, w1r_ref) + b1_ref[...]
    x = jnp.maximum(x, 0.0)                                    # (TB, H)

    # --- GRUCell (PyTorch semantics), single gate slab [r|z|n] ---------------
    h_prev = hidden_ref[...][:, :H]                            # (TB, H) f32
    gi = mm(x, wi_ref) + bi_ref[...]                           # (TB, GP)
    gh = mm(h_prev, wh_ref) + bh_ref[...]                      # (TB, GP)
    r = jax.nn.sigmoid(gi[:, 0:H] + gh[:, 0:H])
    z = jax.nn.sigmoid(gi[:, H:2 * H] + gh[:, H:2 * H])
    n = jnp.tanh(gi[:, 2 * H:3 * H] + r * gh[:, 2 * H:3 * H])
    h_new = (1.0 - z) * n + z * h_prev                         # (TB, H) f32

    # --- fc2 + lane-dense stores ---------------------------------------------
    q_ref[...] = mm(h_new, w2_ref) + b2_ref[...]               # (TB, NA_PAD)
    if HP > H:
        h_out_ref[...] = jnp.concatenate(
            [h_new, jnp.zeros((TB, HP - H), f32)], axis=-1)
    else:
        h_out_ref[...] = h_new


# ------------------------------- wrapper -------------------------------------
@functools.partial(jax.jit, static_argnames=("rnn_hidden_dim", "n_actions"))
def rnn_agent_forward(inputs, hidden_state, ind_obs, packed, *,
                      rnn_hidden_dim, n_actions):
    """One RNNAgent step.

    `hidden_state` may be either the module-style (B, H) / (1, H) tensor (it is
    lane/batch-padded once) or the padded (B_pad, 128) tensor returned by a
    previous call — feed the returned `h` straight back for a zero-copy
    recurrence (input_output_aliases keeps it in place).
    Returns (q[:B, :n_actions], h_padded).
    """
    f32 = jnp.float32
    B, d_in = inputs.shape
    obs_dim = ind_obs.shape[-1]
    H = rnn_hidden_dim
    H_PAD = _round_up(H, LANE)
    NA_PAD = packed["w_fc2"].shape[1]

    # ---- batch tiling: large tiles, minimal batch blow-up --------------------
    if B <= 1024:
        TILE_B = _round_up(B, 8)
    else:
        n_tiles = -(-B // 1024)
        TILE_B = _round_up(-(-B // n_tiles), 8)
    B_pad = _round_up(B, TILE_B)

    def bpad(a):   # batch-row pad (no-op when B is already a tile multiple)
        a = a.astype(f32)
        if a.shape[0] == B_pad:
            return a
        return jnp.pad(a, ((0, B_pad - a.shape[0]), (0, 0)))

    inputs_p = bpad(inputs)
    obs_p = bpad(ind_obs)

    # ---- hidden: padded steady-state layout, or pad once on the first call ---
    if hidden_state.shape == (B_pad, H_PAD):
        hidden_p = hidden_state.astype(f32)
    else:
        h_in = hidden_state.reshape(-1, H)          # module semantics
        if h_in.shape[0] == 1:
            h_in = jnp.broadcast_to(h_in, (B, H))
        hidden_p = jnp.zeros((B_pad, H_PAD), f32).at[:B, :H].set(h_in)

    operands = (
        inputs_p, hidden_p, obs_p,
        packed["w_r1"], packed["b_r1"], packed["w_r2"], packed["b_r2"],
        packed["w_r3"], packed["b_r3"],
        packed["w1_in"], packed["w1_re"], packed["b_fc1"],
        packed["w_i"], packed["b_i"], packed["w_h"], packed["b_h"],
        packed["w_fc2"], packed["b_fc2"],
    )

    grid = (B_pad // TILE_B,)

    def act_spec(feat):
        return pl.BlockSpec((TILE_B, feat), lambda i: (i, 0))

    def resident_spec(a):
        # whole-array block, constant index -> DMA'd once, VMEM-resident.
        return pl.BlockSpec(a.shape, lambda i: (0,) * a.ndim)

    in_specs = [act_spec(d_in), act_spec(H_PAD), act_spec(obs_dim)]
    in_specs += [resident_spec(a) for a in operands[3:]]

    out_specs = (
        pl.BlockSpec((TILE_B, NA_PAD), lambda i: (i, 0)),
        pl.BlockSpec((TILE_B, H_PAD), lambda i: (i, 0)),
    )
    out_shape = (
        jax.ShapeDtypeStruct((B_pad, NA_PAD), f32),
        jax.ShapeDtypeStruct((B_pad, H_PAD), f32),
    )

    # Advisory cost estimate (real shapes, not padded slabs).
    w_keys = ("w_r1", "w_r2", "w_r3", "w1_in", "w1_re", "w_i", "w_h", "w_fc2")
    flops = sum(2 * B_pad * packed[k].shape[0] * packed[k].shape[1]
                for k in w_keys)
    bytes_accessed = sum(int(a.size) * a.dtype.itemsize for a in operands)
    bytes_accessed += B_pad * (NA_PAD + H_PAD) * 4
    cost = pl.CostEstimate(flops=flops,
                           transcendentals=3 * B_pad * H,
                           bytes_accessed=bytes_accessed)

    q_pad, h_pad = pl.pallas_call(
        functools.partial(rnn_agent_kernel, hidden_dim=H),
        grid=grid,
        in_specs=in_specs,
        out_specs=out_specs,
        out_shape=out_shape,
        input_output_aliases={1: 1},   # padded hidden buffer reused in place
        compiler_params=pltpu.CompilerParams(
            dimension_semantics=("parallel",)),
        cost_estimate=cost,
    )(*operands)

    return q_pad[:B, :n_actions], h_pad


# --------------------------- parameter creation -------------------------------
def make_params(key, input_shape, obs_shape, repre_dim, rnn_hidden_dim, n_actions):
    """Raw (unpadded, f32) parameters. Weights in [in, out] layout, biases 1-D."""
    H = rnn_hidden_dim
    half = 128  # half_repre_hidden
    shapes = {
        # representation MLP: obs -> 256 -> 128 -> repre_dim
        "w_r1": (obs_shape, 2 * half), "b_r1": (2 * half,),
        "w_r2": (2 * half, half),      "b_r2": (half,),
        "w_r3": (half, repre_dim),     "b_r3": (repre_dim,),
        # fc1 acts on concat([inputs, repre])
        "w_fc1": (input_shape + repre_dim, H), "b_fc1": (H,),
        # GRUCell (r, z, n)
        "w_ir": (H, H), "w_iz": (H, H), "w_in": (H, H),
        "b_ir": (H,), "b_iz": (H,), "b_in": (H,),
        "w_hr": (H, H), "w_hz": (H, H), "w_hn": (H, H),
        "b_hr": (H,), "b_hz": (H,), "b_hn": (H,),
        # fc2
        "w_fc2": (H, n_actions), "b_fc2": (n_actions,),
    }
    params = {}
    keys = jax.random.split(key, len(shapes))
    for k, (name, shape) in zip(keys, sorted(shapes.items())):
        params[name] = (0.1 * jax.random.normal(k, shape)).astype(jnp.float32)
    return params


def pack_params(p, input_shape, obs_shape, repre_dim, rnn_hidden_dim, n_actions):
    """One-time packing: bf16 weights, tight K dims, gate slab [r|z|n]."""
    f32, bf16 = jnp.float32, jnp.bfloat16
    H = rnn_hidden_dim
    GP = _round_up(3 * H, LANE)          # single gate slab width (>= 3H)
    NA_PAD = _round_up(n_actions, LANE)  # lane-dense q output

    def b_row(b):
        return b.reshape(1, -1).astype(f32)

    def b_row_pad(b, n_pad):
        return jnp.zeros((1, n_pad), f32).at[0, :b.shape[0]].set(b)

    # fc1 split back into its two tight K blocks (no zero-padded rows).
    w1_in = p["w_fc1"][:input_shape].astype(bf16)     # (input_shape, H)
    w1_re = p["w_fc1"][input_shape:].astype(bf16)     # (repre_dim, H)

    def gate_pack(wr, wz, wn):           # (H, GP) columns [r|z|n|0pad]
        w = jnp.zeros((wr.shape[0], GP), f32)
        w = w.at[:, 0:H].set(wr).at[:, H:2 * H].set(wz).at[:, 2 * H:3 * H].set(wn)
        return w.astype(bf16)

    def gate_bias(br, bz, bn):
        b = jnp.zeros((1, GP), f32)
        return b.at[0, 0:H].set(br).at[0, H:2 * H].set(bz).at[0, 2 * H:3 * H].set(bn)

    packed = {
        "w_r1": p["w_r1"].astype(bf16), "b_r1": b_row(p["b_r1"]),
        "w_r2": p["w_r2"].astype(bf16), "b_r2": b_row(p["b_r2"]),
        "w_r3": p["w_r3"].astype(bf16), "b_r3": b_row(p["b_r3"]),
        "w1_in": w1_in, "w1_re": w1_re, "b_fc1": b_row(p["b_fc1"]),
        "w_i": gate_pack(p["w_ir"], p["w_iz"], p["w_in"]),
        "b_i": gate_bias(p["b_ir"], p["b_iz"], p["b_in"]),
        "w_h": gate_pack(p["w_hr"], p["w_hz"], p["w_hn"]),
        "b_h": gate_bias(p["b_hr"], p["b_hz"], p["b_hn"]),
        "w_fc2": (jnp.zeros((H, NA_PAD), f32)
                  .at[:, :n_actions].set(p["w_fc2"]).astype(bf16)),
        "b_fc2": b_row_pad(p["b_fc2"], NA_PAD),
    }
    return packed


# --------------------------- pure-JAX reference --------------------------------
def reference_forward(inputs, hidden_state, ind_obs, p, rnn_hidden_dim,
                      mirror_bf16=True):
    """Module-faithful reference. mirror_bf16=True rounds matmul operands to
    bf16 (as the kernel's MXU path does) so it can be compared tightly."""
    if mirror_bf16:
        def dot(a, w):
            a = a.astype(jnp.bfloat16).astype(jnp.float32)
            w = w.astype(jnp.bfloat16).astype(jnp.float32)
            return a @ w
    else:
        def dot(a, w):
            return a @ w

    t = jax.nn.relu(dot(ind_obs, p["w_r1"]) + p["b_r1"])
    t = jax.nn.relu(dot(t, p["w_r2"]) + p["b_r2"])
    repre = dot(t, p["w_r3"]) + p["b_r3"]
    cat = jnp.concatenate([inputs, repre], axis=1)
    x = jax.nn.relu(dot(cat, p["w_fc1"]) + p["b_fc1"])
    h_in = hidden_state.reshape(-1, rnn_hidden_dim)
    r = jax.nn.sigmoid(dot(x, p["w_ir"]) + p["b_ir"] + dot(h_in, p["w_hr"]) + p["b_hr"])
    z = jax.nn.sigmoid(dot(x, p["w_iz"]) + p["b_iz"] + dot(h_in, p["w_hz"]) + p["b_hz"])
    n = jnp.tanh(dot(x, p["w_in"]) + p["b_in"] + r * (dot(h_in, p["w_hn"]) + p["b_hn"]))
    h = (1.0 - z) * n + z * h_in
    q = dot(h, p["w_fc2"]) + p["b_fc2"]
    return q, h


# ----------------------------------- main --------------------------------------
if __name__ == "__main__":
    B = 8                # batch (e.g. n_agents * batch_size_run)
    input_shape = 40     # agent input features
    obs_shape = 32       # args.obs_shape
    repre_dim = 16       # args.repre_dim
    rnn_hidden_dim = 32  # args.rnn_hidden_dim
    n_actions = 6        # args.n_actions

    key = jax.random.PRNGKey(0)
    k_in, k_obs, k_p = jax.random.split(key, 3)

    inputs = jax.random.normal(k_in, (B, input_shape), dtype=jnp.float32)
    # init_hidden() in the module is zeros of shape (1, H); broadcast to batch.
    hidden_state = jnp.zeros((B, rnn_hidden_dim), dtype=jnp.float32)
    ind_obs = jax.random.normal(k_obs, (B, obs_shape), dtype=jnp.float32)

    raw = make_params(k_p, input_shape, obs_shape, repre_dim,
                      rnn_hidden_dim, n_actions)
    packed = pack_params(raw, input_shape, obs_shape, repre_dim,
                         rnn_hidden_dim, n_actions)

    # ---- step 1 ----
    q, h_pad = rnn_agent_forward(inputs, hidden_state, ind_obs, packed,
                                 rnn_hidden_dim=rnn_hidden_dim,
                                 n_actions=n_actions)
    q, h_pad = jax.block_until_ready((q, h_pad))
    h = h_pad[:B, :rnn_hidden_dim]

    q_ref, h_ref = reference_forward(inputs, hidden_state, ind_obs, raw,
                                     rnn_hidden_dim, mirror_bf16=True)
    assert jnp.allclose(q, q_ref, atol=5e-3, rtol=5e-3), \
        float(jnp.abs(q - q_ref).max())
    assert jnp.allclose(h, h_ref, atol=5e-3, rtol=5e-3), \
        float(jnp.abs(h - h_ref).max())

    # informational: drift vs. the pure-f32 module (bf16 weight quantization)
    q_f32, h_f32 = reference_forward(inputs, hidden_state, ind_obs, raw,
                                     rnn_hidden_dim, mirror_bf16=False)
    print("max |q - q_f32| (bf16 quantization):",
          float(jnp.abs(q - q_f32).max()))

    # ---- step 2: feed the padded hidden straight back (in-place alias path) ----
    q2, h2_pad = rnn_agent_forward(inputs, h_pad, ind_obs, packed,
                                   rnn_hidden_dim=rnn_hidden_dim,
                                   n_actions=n_actions)
    q2, h2_pad = jax.block_until_ready((q2, h2_pad))
    h2 = h2_pad[:B, :rnn_hidden_dim]

    q2_ref, h2_ref = reference_forward(inputs, h_ref, ind_obs, raw,
                                       rnn_hidden_dim, mirror_bf16=True)
    assert jnp.allclose(q2, q2_ref, atol=5e-3, rtol=5e-3), \
        float(jnp.abs(q2 - q2_ref).max())
    assert jnp.allclose(h2, h2_ref, atol=5e-3, rtol=5e-3), \
        float(jnp.abs(h2 - h2_ref).max())

    print("KERNEL_OK")
</pallas_src>

<mosaic_0001>
module attributes {stable_mosaic.version = 11 : i64} {
  func.func @rnn_agent_kernel(%arg0: i32, %arg1: memref<8x40xf32, #tpu.memory_space<vmem>>, %arg2: memref<8x128xf32, #tpu.memory_space<vmem>>, %arg3: memref<8x32xf32, #tpu.memory_space<vmem>>, %arg4: memref<32x256xbf16, #tpu.memory_space<vmem>>, %arg5: memref<1x256xf32, #tpu.memory_space<vmem>>, %arg6: memref<256x128xbf16, #tpu.memory_space<vmem>>, %arg7: memref<1x128xf32, #tpu.memory_space<vmem>>, %arg8: memref<128x16xbf16, #tpu.memory_space<vmem>>, %arg9: memref<1x16xf32, #tpu.memory_space<vmem>>, %arg10: memref<40x32xbf16, #tpu.memory_space<vmem>>, %arg11: memref<16x32xbf16, #tpu.memory_space<vmem>>, %arg12: memref<1x32xf32, #tpu.memory_space<vmem>>, %arg13: memref<32x128xbf16, #tpu.memory_space<vmem>>, %arg14: memref<1x128xf32, #tpu.memory_space<vmem>>, %arg15: memref<32x128xbf16, #tpu.memory_space<vmem>>, %arg16: memref<1x128xf32, #tpu.memory_space<vmem>>, %arg17: memref<32x128xbf16, #tpu.memory_space<vmem>>, %arg18: memref<1x128xf32, #tpu.memory_space<vmem>>, %arg19: memref<8x128xf32, #tpu.memory_space<vmem>>, %arg20: memref<8x128xf32, #tpu.memory_space<vmem>>) attributes {dimension_semantics = [#tpu.dimension_semantics<parallel>], iteration_bounds = array<i64: 1>, scalar_prefetch = 0 : i64, scratch_operands = 0 : i64, tpu.core_type = #tpu.core_type<tc>, window_params = [{transform_indices = @transform_0, window_bounds = array<i64: 8, 40>}, {transform_indices = @transform_1, window_bounds = array<i64: 8, 128>}, {transform_indices = @transform_2, window_bounds = array<i64: 8, 32>}, {pipeline_mode = #tpu.pipeline_mode<synchronous>, transform_indices = @transform_3, window_bounds = array<i64: 32, 256>}, {pipeline_mode = #tpu.pipeline_mode<synchronous>, transform_indices = @transform_4, window_bounds = array<i64: 1, 256>}, {pipeline_mode = #tpu.pipeline_mode<synchronous>, transform_indices = @transform_5, window_bounds = array<i64: 256, 128>}, {pipeline_mode = #tpu.pipeline_mode<synchronous>, transform_indices = @transform_6, window_bounds = array<i64: 1, 128>}, {pipeline_mode = #tpu.pipeline_mode<synchronous>, transform_indices = @transform_7, window_bounds = array<i64: 128, 16>}, {pipeline_mode = #tpu.pipeline_mode<synchronous>, transform_indices = @transform_8, window_bounds = array<i64: 1, 16>}, {pipeline_mode = #tpu.pipeline_mode<synchronous>, transform_indices = @transform_9, window_bounds = array<i64: 40, 32>}, {pipeline_mode = #tpu.pipeline_mode<synchronous>, transform_indices = @transform_10, window_bounds = array<i64: 16, 32>}, {pipeline_mode = #tpu.pipeline_mode<synchronous>, transform_indices = @transform_11, window_bounds = array<i64: 1, 32>}, {pipeline_mode = #tpu.pipeline_mode<synchronous>, transform_indices = @transform_12, window_bounds = array<i64: 32, 128>}, {pipeline_mode = #tpu.pipeline_mode<synchronous>, transform_indices = @transform_13, window_bounds = array<i64: 1, 128>}, {pipeline_mode = #tpu.pipeline_mode<synchronous>, transform_indices = @transform_14, window_bounds = array<i64: 32, 128>}, {pipeline_mode = #tpu.pipeline_mode<synchronous>, transform_indices = @transform_15, window_bounds = array<i64: 1, 128>}, {pipeline_mode = #tpu.pipeline_mode<synchronous>, transform_indices = @transform_16, window_bounds = array<i64: 32, 128>}, {pipeline_mode = #tpu.pipeline_mode<synchronous>, transform_indices = @transform_17, window_bounds = array<i64: 1, 128>}, {transform_indices = @transform_18, window_bounds = array<i64: 8, 128>}, {transform_indices = @transform_19, window_bounds = array<i64: 8, 128>}]} {
    %c0 = arith.constant 0 : index
    %c0_0 = arith.constant 0 : index
    %0 = vector.load %arg3[%c0, %c0_0] : memref<8x32xf32, #tpu.memory_space<vmem>>, vector<8x32xf32>
    %1 = arith.truncf %0 : vector<8x32xf32> to vector<8x32xbf16>
    %c0_1 = arith.constant 0 : index
    %c0_2 = arith.constant 0 : index
    %2 = vector.load %arg4[%c0_1, %c0_2] : memref<32x256xbf16, #tpu.memory_space<vmem>>, vector<32x256xbf16>
    %cst = arith.constant dense<0.000000e+00> : vector<8x256xf32>
    %3 = tpu.matmul %1, %2, %cst {dimension_numbers = #tpu.dot_dimension_numbers<[1], [0], [0], [1], [0, 0, 1, 1], [], []>} : vector<8x32xbf16>, vector<32x256xbf16>, vector<8x256xf32> -> vector<8x256xf32>
    %c0_3 = arith.constant 0 : index
    %c0_4 = arith.constant 0 : index
    %4 = vector.load %arg5[%c0_3, %c0_4] : memref<1x256xf32, #tpu.memory_space<vmem>>, vector<1x256xf32>
    %5 = vector.broadcast %4 : vector<1x256xf32> to vector<8x256xf32>
    %6 = arith.addf %3, %5 : vector<8x256xf32>
    %cst_5 = arith.constant 0.000000e+00 : f32
    %7 = vector.broadcast %cst_5 : f32 to vector<8x256xf32>
    %8 = arith.maximumf %6, %7 : vector<8x256xf32>
    %9 = arith.truncf %8 : vector<8x256xf32> to vector<8x256xbf16>
    %c0_6 = arith.constant 0 : index
    %c0_7 = arith.constant 0 : index
    %10 = vector.load %arg6[%c0_6, %c0_7] : memref<256x128xbf16, #tpu.memory_space<vmem>>, vector<256x128xbf16>
    %cst_8 = arith.constant dense<0.000000e+00> : vector<8x128xf32>
    %11 = tpu.matmul %9, %10, %cst_8 {dimension_numbers = #tpu.dot_dimension_numbers<[1], [0], [0], [1], [0, 0, 1, 1], [], []>} : vector<8x256xbf16>, vector<256x128xbf16>, vector<8x128xf32> -> vector<8x128xf32>
    %c0_9 = arith.constant 0 : index
    %c0_10 = arith.constant 0 : index
    %12 = vector.load %arg7[%c0_9, %c0_10] : memref<1x128xf32, #tpu.memory_space<vmem>>, vector<1x128xf32>
    %13 = vector.broadcast %12 : vector<1x128xf32> to vector<8x128xf32>
    %14 = arith.addf %11, %13 : vector<8x128xf32>
    %cst_11 = arith.constant 0.000000e+00 : f32
    %15 = vector.broadcast %cst_11 : f32 to vector<8x128xf32>
    %16 = arith.maximumf %14, %15 : vector<8x128xf32>
    %17 = arith.truncf %16 : vector<8x128xf32> to vector<8x128xbf16>
    %c0_12 = arith.constant 0 : index
    %c0_13 = arith.constant 0 : index
    %18 = vector.load %arg8[%c0_12, %c0_13] : memref<128x16xbf16, #tpu.memory_space<vmem>>, vector<128x16xbf16>
    %cst_14 = arith.constant dense<0.000000e+00> : vector<8x16xf32>
    %19 = tpu.matmul %17, %18, %cst_14 {dimension_numbers = #tpu.dot_dimension_numbers<[1], [0], [0], [1], [0, 0, 1, 1], [], []>} : vector<8x128xbf16>, vector<128x16xbf16>, vector<8x16xf32> -> vector<8x16xf32>
    %c0_15 = arith.constant 0 : index
    %c0_16 = arith.constant 0 : index
    %20 = vector.load %arg9[%c0_15, %c0_16] : memref<1x16xf32, #tpu.memory_space<vmem>>, vector<1x16xf32>
    %21 = vector.broadcast %20 : vector<1x16xf32> to vector<8x16xf32>
    %22 = arith.addf %19, %21 : vector<8x16xf32>
    %c0_17 = arith.constant 0 : index
    %c0_18 = arith.constant 0 : index
    %23 = vector.load %arg1[%c0_17, %c0_18] : memref<8x40xf32, #tpu.memory_space<vmem>>, vector<8x40xf32>
    %24 = arith.truncf %23 : vector<8x40xf32> to vector<8x40xbf16>
    %c0_19 = arith.constant 0 : index
    %c0_20 = arith.constant 0 : index
    %25 = vector.load %arg10[%c0_19, %c0_20] : memref<40x32xbf16, #tpu.memory_space<vmem>>, vector<40x32xbf16>
    %cst_21 = arith.constant dense<0.000000e+00> : vector<8x32xf32>
    %26 = tpu.matmul %24, %25, %cst_21 {dimension_numbers = #tpu.dot_dimension_numbers<[1], [0], [0], [1], [0, 0, 1, 1], [], []>} : vector<8x40xbf16>, vector<40x32xbf16>, vector<8x32xf32> -> vector<8x32xf32>
    %27 = arith.truncf %22 : vector<8x16xf32> to vector<8x16xbf16>
    %c0_22 = arith.constant 0 : index
    %c0_23 = arith.constant 0 : index
    %28 = vector.load %arg11[%c0_22, %c0_23] : memref<16x32xbf16, #tpu.memory_space<vmem>>, vector<16x32xbf16>
    %cst_24 = arith.constant dense<0.000000e+00> : vector<8x32xf32>
    %29 = tpu.matmul %27, %28, %cst_24 {dimension_numbers = #tpu.dot_dimension_numbers<[1], [0], [0], [1], [0, 0, 1, 1], [], []>} : vector<8x16xbf16>, vector<16x32xbf16>, vector<8x32xf32> -> vector<8x32xf32>
    %30 = arith.addf %26, %29 : vector<8x32xf32>
    %c0_25 = arith.constant 0 : index
    %c0_26 = arith.constant 0 : index
    %31 = vector.load %arg12[%c0_25, %c0_26] : memref<1x32xf32, #tpu.memory_space<vmem>>, vector<1x32xf32>
    %32 = vector.broadcast %31 : vector<1x32xf32> to vector<8x32xf32>
    %33 = arith.addf %30, %32 : vector<8x32xf32>
    %cst_27 = arith.constant 0.000000e+00 : f32
    %34 = vector.broadcast %cst_27 : f32 to vector<8x32xf32>
    %35 = arith.maximumf %33, %34 : vector<8x32xf32>
    %c0_28 = arith.constant 0 : index
    %c0_29 = arith.constant 0 : index
    %36 = vector.load %arg2[%c0_28, %c0_29] : memref<8x128xf32, #tpu.memory_space<vmem>>, vector<8x128xf32>
    %37 = vector.extract_strided_slice %36 {offsets = [0, 0], sizes = [8, 32], strides = [1, 1]} : vector<8x128xf32> to vector<8x32xf32>
    %38 = arith.truncf %35 : vector<8x32xf32> to vector<8x32xbf16>
    %c0_30 = arith.constant 0 : index
    %c0_31 = arith.constant 0 : index
    %39 = vector.load %arg13[%c0_30, %c0_31] : memref<32x128xbf16, #tpu.memory_space<vmem>>, vector<32x128xbf16>
    %cst_32 = arith.constant dense<0.000000e+00> : vector<8x128xf32>
    %40 = tpu.matmul %38, %39, %cst_32 {dimension_numbers = #tpu.dot_dimension_numbers<[1], [0], [0], [1], [0, 0, 1, 1], [], []>} : vector<8x32xbf16>, vector<32x128xbf16>, vector<8x128xf32> -> vector<8x128xf32>
    %c0_33 = arith.constant 0 : index
    %c0_34 = arith.constant 0 : index
    %41 = vector.load %arg14[%c0_33, %c0_34] : memref<1x128xf32, #tpu.memory_space<vmem>>, vector<1x128xf32>
    %42 = vector.broadcast %41 : vector<1x128xf32> to vector<8x128xf32>
    %43 = arith.addf %40, %42 : vector<8x128xf32>
    %44 = arith.truncf %37 : vector<8x32xf32> to vector<8x32xbf16>
    %c0_35 = arith.constant 0 : index
    %c0_36 = arith.constant 0 : index
    %45 = vector.load %arg15[%c0_35, %c0_36] : memref<32x128xbf16, #tpu.memory_space<vmem>>, vector<32x128xbf16>
    %cst_37 = arith.constant dense<0.000000e+00> : vector<8x128xf32>
    %46 = tpu.matmul %44, %45, %cst_37 {dimension_numbers = #tpu.dot_dimension_numbers<[1], [0], [0], [1], [0, 0, 1, 1], [], []>} : vector<8x32xbf16>, vector<32x128xbf16>, vector<8x128xf32> -> vector<8x128xf32>
    %c0_38 = arith.constant 0 : index
    %c0_39 = arith.constant 0 : index
    %47 = vector.load %arg16[%c0_38, %c0_39] : memref<1x128xf32, #tpu.memory_space<vmem>>, vector<1x128xf32>
    %48 = vector.broadcast %47 : vector<1x128xf32> to vector<8x128xf32>
    %49 = arith.addf %46, %48 : vector<8x128xf32>
    %50 = vector.extract_strided_slice %43 {offsets = [0, 0], sizes = [8, 32], strides = [1, 1]} : vector<8x128xf32> to vector<8x32xf32>
    %51 = vector.extract_strided_slice %49 {offsets = [0, 0], sizes = [8, 32], strides = [1, 1]} : vector<8x128xf32> to vector<8x32xf32>
    %52 = arith.addf %50, %51 : vector<8x32xf32>
    %53 = arith.negf %52 : vector<8x32xf32>
    %54 = math.exp %53 : vector<8x32xf32>
    %cst_40 = arith.constant 1.000000e+00 : f32
    %55 = vector.broadcast %cst_40 : f32 to vector<8x32xf32>
    %56 = arith.addf %55, %54 : vector<8x32xf32>
    %57 = arith.divf %55, %56 : vector<8x32xf32>
    %58 = vector.extract_strided_slice %43 {offsets = [0, 32], sizes = [8, 32], strides = [1, 1]} : vector<8x128xf32> to vector<8x32xf32>
    %59 = vector.extract_strided_slice %49 {offsets = [0, 32], sizes = [8, 32], strides = [1, 1]} : vector<8x128xf32> to vector<8x32xf32>
    %60 = arith.addf %58, %59 : vector<8x32xf32>
    %61 = arith.negf %60 : vector<8x32xf32>
    %62 = math.exp %61 : vector<8x32xf32>
    %cst_41 = arith.constant 1.000000e+00 : f32
    %63 = vector.broadcast %cst_41 : f32 to vector<8x32xf32>
    %64 = arith.addf %63, %62 : vector<8x32xf32>
    %65 = arith.divf %63, %64 : vector<8x32xf32>
    %66 = vector.extract_strided_slice %43 {offsets = [0, 64], sizes = [8, 32], strides = [1, 1]} : vector<8x128xf32> to vector<8x32xf32>
    %67 = vector.extract_strided_slice %49 {offsets = [0, 64], sizes = [8, 32], strides = [1, 1]} : vector<8x128xf32> to vector<8x32xf32>
    %68 = arith.mulf %57, %67 : vector<8x32xf32>
    %69 = arith.addf %66, %68 : vector<8x32xf32>
    %70 = math.tanh %69 : vector<8x32xf32>
    %cst_42 = arith.constant 1.000000e+00 : f32
    %71 = vector.broadcast %cst_42 : f32 to vector<8x32xf32>
    %72 = arith.subf %71, %65 : vector<8x32xf32>
    %73 = arith.mulf %72, %70 : vector<8x32xf32>
    %74 = arith.mulf %65, %37 : vector<8x32xf32>
    %75 = arith.addf %73, %74 : vector<8x32xf32>
    %76 = arith.truncf %75 : vector<8x32xf32> to vector<8x32xbf16>
    %c0_43 = arith.constant 0 : index
    %c0_44 = arith.constant 0 : index
    %77 = vector.load %arg17[%c0_43, %c0_44] : memref<32x128xbf16, #tpu.memory_space<vmem>>, vector<32x128xbf16>
    %cst_45 = arith.constant dense<0.000000e+00> : vector<8x128xf32>
    %78 = tpu.matmul %76, %77, %cst_45 {dimension_numbers = #tpu.dot_dimension_numbers<[1], [0], [0], [1], [0, 0, 1, 1], [], []>} : vector<8x32xbf16>, vector<32x128xbf16>, vector<8x128xf32> -> vector<8x128xf32>
    %c0_46 = arith.constant 0 : index
    %c0_47 = arith.constant 0 : index
    %79 = vector.load %arg18[%c0_46, %c0_47] : memref<1x128xf32, #tpu.memory_space<vmem>>, vector<1x128xf32>
    %80 = vector.broadcast %79 : vector<1x128xf32> to vector<8x128xf32>
    %81 = arith.addf %78, %80 : vector<8x128xf32>
    %c0_48 = arith.constant 0 : index
    %c0_49 = arith.constant 0 : index
    %82 = vector.load %arg19[%c0_48, %c0_49] : memref<8x128xf32, #tpu.memory_space<vmem>>, vector<8x128xf32>
    tpu.vector_store %arg19[%c0_48, %c0_49], %81 {strides = array<i32>} : memref<8x128xf32, #tpu.memory_space<vmem>>, vector<8x128xf32>,
    %cst_50 = arith.constant 0.000000e+00 : f32
    %83 = vector.broadcast %cst_50 : f32 to vector<8x96xf32>
    %84 = tpu.concatenate %75, %83 in 1 : vector<8x32xf32>, vector<8x96xf32> -> vector<8x128xf32>
    %c0_51 = arith.constant 0 : index
    %c0_52 = arith.constant 0 : index
    %85 = vector.load %arg20[%c0_51, %c0_52] : memref<8x128xf32, #tpu.memory_space<vmem>>, vector<8x128xf32>
    tpu.vector_store %arg20[%c0_51, %c0_52], %84 {strides = array<i32>} : memref<8x128xf32, #tpu.memory_space<vmem>>, vector<8x128xf32>,
    return
  }
  func.func @transform_0(%arg0: i32) -> (i32, i32) {
    %c0_i32 = arith.constant 0 : i32
    %c0_i32_0 = arith.constant 0 : i32
    return %arg0, %c0_i32 : i32, i32
  }
  func.func @transform_1(%arg0: i32) -> (i32, i32) {
    %c0_i32 = arith.constant 0 : i32
    %c0_i32_0 = arith.constant 0 : i32
    return %arg0, %c0_i32 : i32, i32
  }
  func.func @transform_2(%arg0: i32) -> (i32, i32) {
    %c0_i32 = arith.constant 0 : i32
    %c0_i32_0 = arith.constant 0 : i32
    return %arg0, %c0_i32 : i32, i32
  }
  func.func @transform_3(%arg0: i32) -> (i32, i32) {
    %c0_i32 = arith.constant 0 : i32
    %c0_i32_0 = arith.constant 0 : i32
    %c0_i32_1 = arith.constant 0 : i32
    return %c0_i32, %c0_i32_0 : i32, i32
  }
  func.func @transform_4(%arg0: i32) -> (i32, i32) {
    %c0_i32 = arith.constant 0 : i32
    %c0_i32_0 = arith.constant 0 : i32
    %c0_i32_1 = arith.constant 0 : i32
    return %c0_i32, %c0_i32_0 : i32, i32
  }
  func.func @transform_5(%arg0: i32) -> (i32, i32) {
    %c0_i32 = arith.constant 0 : i32
    %c0_i32_0 = arith.constant 0 : i32
    %c0_i32_1 = arith.constant 0 : i32
    return %c0_i32, %c0_i32_0 : i32, i32
  }
  func.func @transform_6(%arg0: i32) -> (i32, i32) {
    %c0_i32 = arith.constant 0 : i32
    %c0_i32_0 = arith.constant 0 : i32
    %c0_i32_1 = arith.constant 0 : i32
    return %c0_i32, %c0_i32_0 : i32, i32
  }
  func.func @transform_7(%arg0: i32) -> (i32, i32) {
    %c0_i32 = arith.constant 0 : i32
    %c0_i32_0 = arith.constant 0 : i32
    %c0_i32_1 = arith.constant 0 : i32
    return %c0_i32, %c0_i32_0 : i32, i32
  }
  func.func @transform_8(%arg0: i32) -> (i32, i32) {
    %c0_i32 = arith.constant 0 : i32
    %c0_i32_0 = arith.constant 0 : i32
    %c0_i32_1 = arith.constant 0 : i32
    return %c0_i32, %c0_i32_0 : i32, i32
  }
  func.func @transform_9(%arg0: i32) -> (i32, i32) {
    %c0_i32 = arith.constant 0 : i32
    %c0_i32_0 = arith.constant 0 : i32
    %c0_i32_1 = arith.constant 0 : i32
    return %c0_i32, %c0_i32_0 : i32, i32
  }
  func.func @transform_10(%arg0: i32) -> (i32, i32) {
    %c0_i32 = arith.constant 0 : i32
    %c0_i32_0 = arith.constant 0 : i32
    %c0_i32_1 = arith.constant 0 : i32
    return %c0_i32, %c0_i32_0 : i32, i32
  }
  func.func @transform_11(%arg0: i32) -> (i32, i32) {
    %c0_i32 = arith.constant 0 : i32
    %c0_i32_0 = arith.constant 0 : i32
    %c0_i32_1 = arith.constant 0 : i32
    return %c0_i32, %c0_i32_0 : i32, i32
  }
  func.func @transform_12(%arg0: i32) -> (i32, i32) {
    %c0_i32 = arith.constant 0 : i32
    %c0_i32_0 = arith.constant 0 : i32
    %c0_i32_1 = arith.constant 0 : i32
    return %c0_i32, %c0_i32_0 : i32, i32
  }
  func.func @transform_13(%arg0: i32) -> (i32, i32) {
    %c0_i32 = arith.constant 0 : i32
    %c0_i32_0 = arith.constant 0 : i32
    %c0_i32_1 = arith.constant 0 : i32
    return %c0_i32, %c0_i32_0 : i32, i32
  }
  func.func @transform_14(%arg0: i32) -> (i32, i32) {
    %c0_i32 = arith.constant 0 : i32
    %c0_i32_0 = arith.constant 0 : i32
    %c0_i32_1 = arith.constant 0 : i32
    return %c0_i32, %c0_i32_0 : i32, i32
  }
  func.func @transform_15(%arg0: i32) -> (i32, i32) {
    %c0_i32 = arith.constant 0 : i32
    %c0_i32_0 = arith.constant 0 : i32
    %c0_i32_1 = arith.constant 0 : i32
    return %c0_i32, %c0_i32_0 : i32, i32
  }
  func.func @transform_16(%arg0: i32) -> (i32, i32) {
    %c0_i32 = arith.constant 0 : i32
    %c0_i32_0 = arith.constant 0 : i32
    %c0_i32_1 = arith.constant 0 : i32
    return %c0_i32, %c0_i32_0 : i32, i32
  }
  func.func @transform_17(%arg0: i32) -> (i32, i32) {
    %c0_i32 = arith.constant 0 : i32
    %c0_i32_0 = arith.constant 0 : i32
    %c0_i32_1 = arith.constant 0 : i32
    return %c0_i32, %c0_i32_0 : i32, i32
  }
  func.func @transform_18(%arg0: i32) -> (i32, i32) {
    %c0_i32 = arith.constant 0 : i32
    %c0_i32_0 = arith.constant 0 : i32
    return %arg0, %c0_i32 : i32, i32
  }
  func.func @transform_19(%arg0: i32) -> (i32, i32) {
    %c0_i32 = arith.constant 0 : i32
    %c0_i32_0 = arith.constant 0 : i32
    return %arg0, %c0_i32 : i32, i32
  }
}

</mosaic_0001>

<bundles_post_ra>
// kernel: rnn_agent_forward.1
= control target key start
LH: loop header
LB: loop body
LE: loop exit
PB: predicated region body
PF: predicated region fallthrough
CT: control target
= control target key end

     0   :  { %s1806_s0 = inlined_call_operand.vmem [shape: f32[8,40], index: 0, kind: input, shape index: {}]   ;;  %s1807_s1 = inlined_call_operand.vmem [shape: f32[8,128], index: 1, kind: input, shape index: {}, may-alias: {1,19}]   ;;  %s1808_s2 = inlined_call_operand.hbm [shape: f32[8,32], index: 2, kind: input, shape index: {}]   ;;  %s1809_s3 = inlined_call_operand.vmem [shape: bf16[32,256], index: 3, kind: input, shape index: {}]   ;;  %s1810_s4 = inlined_call_operand.vmem [shape: f32[1,256], index: 4, kind: input, shape index: {}]   ;;  %s1811_s5 = inlined_call_operand.vmem [shape: bf16[256,128], index: 5, kind: input, shape index: {}]   ;;  %s1812_s6 = inlined_call_operand.hbm [shape: f32[1,128], index: 6, kind: input, shape index: {}]   ;;  %s1813_s7 = inlined_call_operand.vmem [shape: bf16[128,16], index: 7, kind: input, shape index: {}]   ;;  %s1814_s8 = inlined_call_operand.hbm [shape: f32[1,16], index: 8, kind: input, shape index: {}]   ;;  %s1815_s9 = inlined_call_operand.vmem [shape: bf16[40,32], index: 9, kind: input, shape index: {}]   ;;  %s1816_s10 = inlined_call_operand.hbm [shape: bf16[16,32], index: 10, kind: input, shape index: {}]   ;;  %s1817_s11 = inlined_call_operand.hbm [shape: f32[1,32], index: 11, kind: input, shape index: {}]   ;;  %s1818_s12 = inlined_call_operand.vmem [shape: bf16[32,128], index: 12, kind: input, shape index: {}]   ;;  %s1819_s13 = inlined_call_operand.hbm [shape: f32[1,128], index: 13, kind: input, shape index: {}]   ;;  %s1820_s14 = inlined_call_operand.vmem [shape: bf16[32,128], index: 14, kind: input, shape index: {}]   ;;  %s1821_s15 = inlined_call_operand.hbm [shape: f32[1,128], index: 15, kind: input, shape index: {}]   ;;  %s1822_s16 = inlined_call_operand.hbm [shape: bf16[32,128], index: 16, kind: input, shape index: {}]   ;;  %s1823_s17 = inlined_call_operand.hbm [shape: f32[1,128], index: 17, kind: input, shape index: {}]   ;;  %s1824_s18 = inlined_call_operand.hbm [shape: f32[8,128], index: 18, kind: output, shape index: {0}]   ;;  %s1825_s19 = inlined_call_operand.vmem [shape: f32[8,128], index: 19, kind: output, shape index: {1}, may-alias: {1,19}]  }
   0x1   :  { %1828 = sst [smem:[#allocation24_spill]] %s1806_s0 }
   0x2   :  { %1829 = sst [smem:[#allocation25_spill]] %s1807_s1 }
   0x3   :  { %1830 = sst [smem:[#allocation26_spill]] %s1808_s2 }
   0x4   :  { %1831 = sst [smem:[#allocation27_spill]] %s1809_s3 }
   0x5   :  { %25 = vsyncpa [#allocation3], 0 }
   0x6   :  { %26 = vsyncpa [#allocation6], 0 }
   0x7   :  { %27 = vsyncpa [#allocation9], 0 }
   0x8   :  { %28 = vsyncpa [#allocation12], 0 }
   0x9   :  { %29 = vsyncpa [#allocation15], 0 }
   0xa   :  { %30 = vsyncpa [#allocation4], 0  ;;  %s1395_s0 = smov [#allocation5]   ;;  %s1396_s20 = smov [#allocation8]  }
   0xb   :  { %s57_s30 = sshll.u32 %s1395_s0, 4  ;;  %s80_s21 = sshll.u32 %s1396_s20, 4  ;;  %s58_s30 = int_to_ptr.vmem [resolvable:$true] %s57_s30  ;;  %s1512_s21 = int_to_ptr.vmem [resolvable:$true] %s80_s21 }
   0xc   :  { %s1163_s2 = scalar_lea.hbm %s1812_s6, 16 }
   0xd   :  { %p1164_p0 = scmp.ne.s32.totalorder %s1812_s6, %s1163_s2  ;;  %p1167_p1 = scmp.lt.u32.totalorder %s1163_s2, %s1812_s6 }
   0xf   :  { %p1169_p2 = pnand %p1167_p1, %p1164_p0 }
  0x11   :  { %1172 = shalt.err (!%p1169_p2)
}
  0x12   :  { %s1173_s26 = scalar_lea.vmem %s58_s30, 16  ;;  %s1177_s27 = scalar_lea.vmem %s58_s30, 32 }
  0x13   :  { %p1174_p3 = scmp.ne.s32.totalorder %s58_s30, %s1173_s26  ;;  %p1178_p4 = scmp.lt.s32.totalorder %s58_s30, %s58_s30 }
  0x14   :  { %p1179_p5 = scmp.lt.s32.totalorder %s1177_s27, %s1173_s26 }
  0x16   :  { %p1180_p6 = por %p1179_p5, %p1178_p4 }
  0x18   :  { %p1181_p7 = pnand %p1180_p6, %p1174_p3 }
  0x1a   :  { %1184 = shalt.err (!%p1181_p7)
}
  0x1b   :  { %60 = dma.hbm_to_vmem [thread:$0]  %s1812_s6, 16, %s58_s30, [#allocation6]  }
  0x1c   :  { %s1185_s1 = scalar_lea.hbm %s1816_s10, 128 }
  0x1d   :  { %p1186_p8 = scmp.ne.s32.totalorder %s1816_s10, %s1185_s1  ;;  %p1189_p9 = scmp.lt.u32.totalorder %s1185_s1, %s1816_s10 }
  0x1f   :  { %p1191_p10 = pnand %p1189_p9, %p1186_p8 }
  0x21   :  { %1194 = shalt.err (!%p1191_p10)
}
  0x22   :  { %s1195_s25 = scalar_lea.vmem %s1512_s21, 128  ;;  %p1200_p12 = scmp.lt.s32.totalorder %s1512_s21, %s1512_s21 }
  0x23   :  { %p1196_p11 = scmp.ne.s32.totalorder %s1512_s21, %s1195_s25  ;;  %p1201_p13 = scmp.lt.s32.totalorder %s1195_s25, %s1195_s25 }
  0x25   :  { %p1202_p0 = por %p1201_p13, %p1200_p12 }
  0x27   :  { %p1203_p1 = pnand %p1202_p0, %p1196_p11 }
  0x29   :  { %1206 = shalt.err (!%p1203_p1)
}
  0x2a   :  { %s1397_s6 = smov 64   ;;  %s1398_s30 = smov 4  }
  0x2b   :  { %86 = dma.hbm_to_vmem [thread:$0]  %s1816_s10, 128, %s1512_s21, [#allocation9], %s1397_s6, %s1397_s6, %s1398_s30  }
  0x2c   :  { %s1399_s27 = smov [#allocation11]   ;;  %s1400_s29 = smov [#allocation14]  }
  0x2d   :  { %s105_s28 = sshll.u32 %s1399_s27, 4  ;;  %s126_s0 = sshll.u32 %s1400_s29, 4  ;;  %s106_s28 = int_to_ptr.vmem [resolvable:$true] %s105_s28  ;;  %s1546_s0 = int_to_ptr.vmem [resolvable:$true] %s126_s0 }
  0x2e   :  { %s1207_s22 = scalar_lea.hbm %s1819_s13, 16 }
  0x2f   :  { %p1208_p2 = scmp.ne.s32.totalorder %s1819_s13, %s1207_s22  ;;  %p1211_p3 = scmp.lt.u32.totalorder %s1207_s22, %s1819_s13 }
  0x31   :  { %p1213_p4 = pnand %p1211_p3, %p1208_p2 }
  0x33   :  { %1216 = shalt.err (!%p1213_p4)
}
  0x34   :  { %s1217_s10 = scalar_lea.vmem %s106_s28, 16  ;;  %s1221_s21 = scalar_lea.vmem %s106_s28, 32 }
  0x35   :  { %p1218_p5 = scmp.ne.s32.totalorder %s106_s28, %s1217_s10  ;;  %p1222_p6 = scmp.lt.s32.totalorder %s106_s28, %s106_s28 }
  0x36   :  { %p1223_p7 = scmp.lt.s32.totalorder %s1221_s21, %s1217_s10 }
  0x38   :  { %p1224_p8 = por %p1223_p7, %p1222_p6 }
  0x3a   :  { %p1225_p9 = pnand %p1224_p8, %p1218_p5 }
  0x3c   :  { %1228 = shalt.err (!%p1225_p9)
}
  0x3d   :  { %108 = dma.hbm_to_vmem [thread:$0]  %s1819_s13, 16, %s106_s28, [#allocation12]  }
  0x3e   :  { %s1229_s20 = scalar_lea.hbm %s1822_s16, 256 }
  0x3f   :  { %p1230_p10 = scmp.ne.s32.totalorder %s1822_s16, %s1229_s20  ;;  %p1233_p11 = scmp.lt.u32.totalorder %s1229_s20, %s1822_s16 }
  0x41   :  { %p1235_p12 = pnand %p1233_p11, %p1230_p10 }
  0x43   :  { %1238 = shalt.err (!%p1235_p12)
}
  0x44   :  { %s1239_s24 = scalar_lea.vmem %s1546_s0, 256  ;;  %p1244_p0 = scmp.lt.s32.totalorder %s1546_s0, %s1546_s0 }
  0x45   :  { %p1240_p13 = scmp.ne.s32.totalorder %s1546_s0, %s1239_s24  ;;  %p1245_p1 = scmp.lt.s32.totalorder %s1239_s24, %s1239_s24 }
  0x47   :  { %p1246_p2 = por %p1245_p1, %p1244_p0 }
  0x49   :  { %p1247_p3 = pnand %p1246_p2, %p1240_p13 }
  0x4b   :  { %1250 = shalt.err (!%p1247_p3)
}
  0x4c   :  { %132 = dma.hbm_to_vmem [thread:$0]  %s1822_s16, 256, %s1546_s0, [#allocation15], %s1397_s6, %s1397_s6, %s1398_s30  }
  0x4d   :  { %s1401_s25 = smov [#allocation2]   ;;  %s1402_s21 = smov [#allocation7]  }
  0x4e   :  { %s41_s10 = sshll.u32 %s1401_s25, 4  ;;  %s69_s3 = sshll.u32 %s1402_s21, 4  ;;  %s42_s10 = int_to_ptr.vmem [resolvable:$true] %s41_s10  ;;  %s70_s3 = int_to_ptr.vmem [resolvable:$true] %s69_s3 }
  0x4f   :  { %s1832_s29 = sld [smem:[#allocation26_spill]] }
  0x55   :  { %s1251_s20 = scalar_lea.hbm %s1832_s29, 128 }
  0x56   :  { %p1252_p4 = scmp.ne.s32.totalorder %s1832_s29, %s1251_s20  ;;  %p1255_p5 = scmp.lt.u32.totalorder %s1251_s20, %s1832_s29 }
  0x58   :  { %p1257_p6 = pnand %p1255_p5, %p1252_p4 }
  0x5a   :  { %1260 = shalt.err (!%p1257_p6)
}
  0x5b   :  { %s1261_s16 = scalar_lea.vmem %s42_s10, 128  ;;  %p1266_p8 = scmp.lt.s32.totalorder %s42_s10, %s42_s10 }
  0x5c   :  { %p1262_p7 = scmp.ne.s32.totalorder %s42_s10, %s1261_s16  ;;  %p1267_p9 = scmp.lt.s32.totalorder %s1261_s16, %s1261_s16 }
  0x5e   :  { %p1268_p10 = por %p1267_p9, %p1266_p8 }
  0x60   :  { %p1269_p11 = pnand %p1268_p10, %p1262_p7 }
  0x62   :  { %1272 = shalt.err (!%p1269_p11)
}
  0x63   :  { %44 = dma.hbm_to_vmem [thread:$0]  %s1832_s29, 128, %s42_s10, [#allocation3]  }
  0x64   :  { %s1273_s28 = scalar_lea.hbm %s1814_s8, 16 }
  0x65   :  { %p1274_p12 = scmp.ne.s32.totalorder %s1814_s8, %s1273_s28  ;;  %p1277_p13 = scmp.lt.u32.totalorder %s1273_s28, %s1814_s8 }
  0x67   :  { %p1279_p0 = pnand %p1277_p13, %p1274_p12 }
  0x69   :  { %1282 = shalt.err (!%p1279_p0)
}
  0x6a   :  { %s1283_s20 = scalar_lea.vmem %s70_s3, 16  ;;  %s1287_s1 = scalar_lea.vmem %s70_s3, 32 }
  0x6b   :  { %p1284_p1 = scmp.ne.s32.totalorder %s70_s3, %s1283_s20  ;;  %p1288_p2 = scmp.lt.s32.totalorder %s70_s3, %s70_s3 }
  0x6c   :  { %p1289_p3 = scmp.lt.s32.totalorder %s1287_s1, %s1283_s20 }
  0x6e   :  { %p1290_p4 = por %p1289_p3, %p1288_p2 }
  0x70   :  { %p1291_p5 = pnand %p1290_p4, %p1284_p1 }
  0x72   :  { %1294 = shalt.err (!%p1291_p5)
}
  0x73   :  { %72 = dma.hbm_to_vmem [thread:$0]  %s1814_s8, 16, %s70_s3, [#allocation6]  }
  0x74   :  { %s1403_s22 = smov [#allocation10]   ;;  %s1404_s23 = smov [#allocation13]  }
  0x75   :  { %s93_s2 = sshll.u32 %s1403_s22, 4  ;;  %s117_s16 = sshll.u32 %s1404_s23, 4  ;;  %s94_s2 = int_to_ptr.vmem [resolvable:$true] %s93_s2  ;;  %s118_s16 = int_to_ptr.vmem [resolvable:$true] %s117_s16 }
  0x76   :  { %s1295_s24 = scalar_lea.hbm %s1817_s11, 16 }
  0x77   :  { %p1296_p6 = scmp.ne.s32.totalorder %s1817_s11, %s1295_s24  ;;  %p1299_p7 = scmp.lt.u32.totalorder %s1295_s24, %s1817_s11 }
  0x79   :  { %p1301_p8 = pnand %p1299_p7, %p1296_p6 }
  0x7b   :  { %1304 = shalt.err (!%p1301_p8)
}
  0x7c   :  { %s1305_s8 = scalar_lea.vmem %s94_s2, 16  ;;  %s1309_s3 = scalar_lea.vmem %s94_s2, 32 }
  0x7d   :  { %p1306_p9 = scmp.ne.s32.totalorder %s94_s2, %s1305_s8  ;;  %p1310_p10 = scmp.lt.s32.totalorder %s94_s2, %s94_s2 }
  0x7e   :  { %p1311_p11 = scmp.lt.s32.totalorder %s1309_s3, %s1305_s8 }
  0x80   :  { %p1312_p12 = por %p1311_p11, %p1310_p10 }
  0x82   :  { %p1313_p13 = pnand %p1312_p12, %p1306_p9 }
  0x84   :  { %1316 = shalt.err (!%p1313_p13)
}
  0x85   :  { %96 = dma.hbm_to_vmem [thread:$0]  %s1817_s11, 16, %s94_s2, [#allocation9]  }
  0x86   :  { %s1317_s10 = scalar_lea.hbm %s1821_s15, 16 }
  0x87   :  { %p1318_p0 = scmp.ne.s32.totalorder %s1821_s15, %s1317_s10  ;;  %p1321_p1 = scmp.lt.u32.totalorder %s1317_s10, %s1821_s15 }
  0x89   :  { %p1323_p2 = pnand %p1321_p1, %p1318_p0 }
  0x8b   :  { %1326 = shalt.err (!%p1323_p2)
}
  0x8c   :  { %s1327_s0 = scalar_lea.vmem %s118_s16, 16  ;;  %s1331_s24 = scalar_lea.vmem %s118_s16, 32 }
  0x8d   :  { %p1328_p3 = scmp.ne.s32.totalorder %s118_s16, %s1327_s0  ;;  %p1332_p4 = scmp.lt.s32.totalorder %s118_s16, %s118_s16 }
  0x8e   :  { %p1333_p5 = scmp.lt.s32.totalorder %s1331_s24, %s1327_s0 }
  0x90   :  { %p1334_p6 = por %p1333_p5, %p1332_p4 }
  0x92   :  { %p1335_p7 = pnand %p1334_p6, %p1328_p3 }
  0x94   :  { %1338 = shalt.err (!%p1335_p7)
}
  0x95   :  { %120 = dma.hbm_to_vmem [thread:$0]  %s1821_s15, 16, %s118_s16, [#allocation12]  }
  0x96   :  { %s1405_s13 = smov [#allocation16]   ;;  %s1339_s8 = scalar_lea.hbm %s1823_s17, 16 }
  0x97   :  { %s139_s28 = sshll.u32 %s1405_s13, 4  ;;  %p1340_p8 = scmp.ne.s32.totalorder %s1823_s17, %s1339_s8  ;;  %s140_s28 = int_to_ptr.vmem [resolvable:$true] %s139_s28 }
  0x98   :  { %p1343_p9 = scmp.lt.u32.totalorder %s1339_s8, %s1823_s17 }
  0x9a   :  { %p1345_p10 = pnand %p1343_p9, %p1340_p8 }
  0x9c   :  { %1348 = shalt.err (!%p1345_p10)
}
  0x9d   :  { %s1349_s1 = scalar_lea.vmem %s140_s28, 16  ;;  %s1353_s15 = scalar_lea.vmem %s140_s28, 32 }
  0x9e   :  { %p1350_p11 = scmp.ne.s32.totalorder %s140_s28, %s1349_s1  ;;  %p1354_p12 = scmp.lt.s32.totalorder %s140_s28, %s140_s28 }
  0x9f   :  { %p1355_p13 = scmp.lt.s32.totalorder %s1353_s15, %s1349_s1 }
  0xa1   :  { %p1356_p0 = por %p1355_p13, %p1354_p12 }
  0xa3   :  { %p1357_p1 = pnand %p1356_p0, %p1350_p11 }
  0xa5   :  { %1360 = shalt.err (!%p1357_p1)
}
  0xa6   :  { %142 = dma.hbm_to_vmem [thread:$0]  %s1823_s17, 16, %s140_s28, [#allocation15]  }
  0xa7   :  { %1383 = dma.done.wait [#allocation3], 128  }
  0xa8   :  { %1384 = vsyncadd [#allocation3], 4294967168 }
  0xa9   :  { %1385 = dma.done.wait [#allocation6], 32  }
  0xaa   :  { %1386 = vsyncadd [#allocation6], 4294967264 }
  0xab   :  { %1387 = dma.done.wait [#allocation9], 144  }
  0xac   :  { %1388 = vsyncadd [#allocation9], 4294967152 }
  0xad   :  { %1389 = dma.done.wait [#allocation12], 32  }
  0xae   :  { %1390 = vsyncadd [#allocation12], 4294967264 }
  0xaf   :  { %1391 = dma.done.wait [#allocation15], 272  }
  0xb0   :  { %1392 = vsyncadd [#allocation15], 4294967024  ;;  %v1406_v0 = vmov 0   ;;  %s1833_s23 = sld [smem:[#allocation27_spill]]  ;;  %v171_v5 = vld [vmem:[#allocation2] sm:$0xff]  ;;  %v1125_v8 = vld [vmem:[%s1811_s5 + $0x48] sm:$0xff]   ;;  %v179_v30 = vlaneseq }
  0xb1   :  { %245 = vmatprep.mubr.bf16.mxu0 %v1406_v0  ;;  %v1123_v6 = vld [vmem:[%s1811_s5 + $0x40] sm:$0xff]   ;;  %v172_v9 = vpack.c.bf16 %v171_v5, %v171_v5  ;;  %v1126_v10 = vld [vmem:[%s1811_s5 + $0x8] sm:$0xff]   ;;  %vm209_vm0 = vcmask 261120   ;;  %v1127_v11 = vld [vmem:[%s1811_s5 + $0x50] sm:$0xff]   ;;  %v1407_v24 = vmov 0.0   ;;  %vm1408_vm1 = vmmov 0  }
  0xb2   :  { %v1124_v7 = vld [vmem:[%s1811_s5] sm:$0xff]   ;;  %994 = vmatprep.subr.bf16.mxu1 %v1123_v6  ;;  %v1128_v12 = vld [vmem:[%s1811_s5 + $0x10] sm:$0xff]   ;;  %v1129_v13 = vld [vmem:[%s1811_s5 + $0x58] sm:$0xff]   ;;  %v180_v31 = vshrl.u32 %v179_v30, 7  ;;  %vm625_vm2 = vcmask 1043456   ;;  %s1834_s16 = sld [smem:[#allocation24_spill]] }
  0xb3   :  { %995 = vmatpush3.bf16.msra.mxu1 %v1124_v7  ;;  %v1130_v14 = vld [vmem:[%s1811_s5 + $0x18] sm:$0xff]   ;;  %v1131_v15 = vld [vmem:[%s1811_s5 + $0x60] sm:$0xff]   ;;  %v1133_v17 = vld [vmem:[%s1811_s5 + $0x68] sm:$0xff]   ;;  %vm621_vm3 = vcmask 326656   ;;  %vm562_vm4 = vcmask 130048   ;;  %s1835_s24 = sld [smem:[#allocation25_spill]] }
  0xb4   :  { %996 = vmatprep.subr.bf16.mxu1 %v1125_v8  ;;  %v1132_v16 = vld [vmem:[%s1811_s5 + $0x20] sm:$0xff]   ;;  %v1134_v18 = vld [vmem:[%s1811_s5 + $0x28] sm:$0xff]   ;;  %v1135_v19 = vld [vmem:[%s1811_s5 + $0x70] sm:$0xff]   ;;  %v181_v32 = vsub.s32 0, %v180_v31  ;;  %v185_v34 = vsub.s32 1, %v180_v31  ;;  %s1410_s11 = smov 32  }
  0xb5   :  { %v1136_v20 = vld [vmem:[%s1811_s5 + $0x30] sm:$0xff]   ;;  %v1137_v21 = vld [vmem:[%s1811_s5 + $0x78] sm:$0xff]   ;;  %v1139_v23 = vld [vmem:[%s1813_s7] sm:$0xff]   ;;  %s1411_s13 = smov [#allocation17]  }
  0xb6   :  { %v1117_v1 = vld [vmem:[%s1833_s23 + $0x4] ss:$8 sps:$4 sm:$0xff]   ;;  %v1119_v2 = vld [vmem:[%s1833_s23] ss:$8 sps:$4 sm:$0xff]   ;;  %v1120_v3 = vld [vmem:[%s1833_s23 + $0x14] ss:$8 sps:$4 sm:$0xff]  }
  0xb7   :  { %213 = vmatprep.subr.bf16.mxu0 %v1117_v1  ;;  %v1122_v4 = vld [vmem:[%s1833_s23 + $0x10] ss:$8 sps:$4 sm:$0xff]   ;;  %997 = vmatpush3.bf16.msra.mxu1 %v1126_v10  ;;  %v1140_v25 = vld [vmem:[%s1813_s7 + $0x8] sm:$0xff]   ;;  %v1143_v28 = vld [vmem:[%s1813_s7 + $0x20] sm:$0xff]   ;;  %s926_s28 = sshll.u32 %s1411_s13, 4  ;;  %s927_s28 = int_to_ptr.vmem [resolvable:$true] %s926_s28 }
  0xb8   :  { %214 = vmatpush1.bf16.msra.mxu0 %v1119_v2  ;;  %998 = vmatprep.subr.bf16.mxu1 %v1127_v11  ;;  %v1138_v22 = vld [vmem:[%s1811_s5 + $0x38] sm:$0xff]   ;;  %v1141_v26 = vld [vmem:[%s1813_s7 + $0x10] sm:$0xff]   ;;  %v1144_v29 = vld [vmem:[%s1813_s7 + $0x28] sm:$0xff]   ;;  %s1361_s25 = scalar_lea.vmem %s927_s28, 128  ;;  %p1366_p3 = scmp.lt.s32.totalorder %s927_s28, %s927_s28 }
  0xb9   :  { %215 = vmatprep.subr.bf16.mxu0 %v1120_v3  ;;  %v1142_v27 = vld [vmem:[%s1813_s7 + $0x18] sm:$0xff]   ;;  %v177_v33 = vld [vmem:[%s1810_s4] sm:$0x3]  ;;  %v1145_v47 = vld [vmem:[%s1813_s7 + $0x30] sm:$0xff]   ;;  %p1362_p2 = scmp.ne.s32.totalorder %s927_s28, %s1361_s25  ;;  %p1367_p4 = scmp.lt.s32.totalorder %s1361_s25, %s1361_s25 }
  0xba   :  { %v182_v35 = vrot.slane %v177_v33, %v181_v32  ;;  %v186_v36 = vrot.slane %v177_v33, %v185_v34  ;;  %v1146_v48 = vld [vmem:[%s1813_s7 + $0x38] sm:$0xff]   ;;  %v1149_v49 = vld [vmem:[#allocation8] sm:$0xff]   ;;  %v948_v51 = vld [vmem:[#allocation5] ss:$0 sm:$0xff] }
  0xbb   :  { %999 = vmatpush3.bf16.msra.mxu1 %v1128_v12  ;;  %v1147_v58 = vld [vmem:[%s1815_s9] sm:$0xff]   ;;  %v1148_v60 = vld [vmem:[%s1815_s9 + $0x8] sm:$0xff]   ;;  %v1150_v61 = vld [vmem:[%s1815_s9 + $0x10] ss:$0 sps:$4 sm:$0xff]   ;;  %p1368_p5 = por %p1367_p4, %p1366_p3 }
  0xbc   :  { %216 = vmatpush1.bf16.msra.mxu0 %v1122_v4  ;;  %1000 = vmatprep.subr.bf16.mxu1 %v1129_v13  ;;  %v627_v62 = vsel %vm625_vm2, %v1150_v61, 0  ;;  %v546_v63 = vld [vmem:[%s1834_s16] sm:$0xff]  ;;  %v965_v1 = vld [vmem:[#allocation7] ss:$0 sm:$0xff]  ;;  %v985_v32 = vld [vmem:[#allocation13] ss:$0 sm:$0xff] }
  0xbd   :  { %1040 = vmatprep.subr.bf16.mxu0 %v1407_v24  ;;  %v547_v0 = vpack.c.bf16 %v546_v63, %v546_v63  ;;  %v1151_v12 = vld [vmem:[%s1818_s12] sm:$0xff]   ;;  %v1152_v13 = vld [vmem:[%s1818_s12 + $0x8] sm:$0xff]   ;;  %p1369_p6 = pnand %p1368_p5, %p1362_p2 }
  0xbe   :  { %v990_v61 = vld [vmem:[#allocation16] ss:$0 sm:$0xff] }
  0xbf   :  { %947 = vmatmul.mubr.msk.bf16.vlgmr.msra.gmra.mrb[0].mxu0 %vm209_vm0, %v172_v9  ;;  %1001 = vmatpush3.bf16.msra.mxu1 %v1130_v14 }
  0xc0   :  { %1002 = vmatprep.subr.bf16.mxu1 %v1131_v15  ;;  %1041 = vmatpush3.bf16.msra.mxu0 %v1139_v23  ;;  %v980_v15 = vld [vmem:[#allocation10] ss:$0 sm:$0xff] }
  0xc1   :  { %1042 = vmatprep.subr.bf16.mxu0 %v1407_v24  ;;  %1056 = vmatprep.mubr.msk.bf16.mxu0 %vm1408_vm1, %v1407_v24 }
  0xc3   :  { %1003 = vmatpush3.bf16.msra.mxu1 %v1132_v16 }
  0xc4   :  { %1004 = vmatprep.subr.bf16.mxu1 %v1133_v17  ;;  %1043 = vmatpush3.bf16.msra.mxu0 %v1140_v25  ;;  %v1154_v25 = vld [vmem:[%s1820_s14 + $0x8] sm:$0xff]  }
  0xc5   :  { %1044 = vmatprep.subr.bf16.mxu0 %v1407_v24 }
  0xc7   :  { %1005 = vmatpush3.bf16.msra.mxu1 %v1134_v18 }
  0xc8   :  { %1006 = vmatprep.subr.bf16.mxu1 %v1135_v19  ;;  %1045 = vmatpush3.bf16.msra.mxu0 %v1141_v26  ;;  %v678_v26 = vld [vmem:[%s1835_s24] sm:$0xff] }
  0xc9   :  { %1046 = vmatprep.subr.bf16.mxu0 %v1407_v24 }
  0xcb   :  { %1007 = vmatpush3.bf16.msra.mxu1 %v1136_v20 }
  0xcc   :  { %1008 = vmatprep.subr.bf16.mxu1 %v1137_v21  ;;  %1047 = vmatpush3.bf16.msra.mxu0 %v1142_v27  ;;  %v746_v27 = vpack.c.bf16 %v678_v26, %v678_v26 }
  0xcd   :  { %1048 = vmatprep.subr.bf16.mxu0 %v1407_v24 }
  0xcf   :  { %1009 = vmatpush3.bf16.msra.mxu1 %v1138_v22  ;;  %v1153_v22 = vld [vmem:[%s1820_s14] sm:$0xff]   ;;  %s1409_s14 = smov 96  }
  0xd0   :  { %1060 = vmatprep.subr.bf16.mxu1 %v1407_v24  ;;  %1049 = vmatpush3.bf16.msra.mxu0 %v1143_v28 }
  0xd1   :  { %1050 = vmatprep.subr.bf16.mxu0 %v1407_v24 }
  0xd4   :  { %1051 = vmatpush3.bf16.msra.mxu0 %v1144_v29 }
  0xd5   :  { %1052 = vmatprep.subr.bf16.mxu0 %v1407_v24 }
  0xd8   :  { %1053 = vmatpush3.bf16.msra.mxu0 %v1145_v47 }
  0xd9   :  { %1054 = vmatprep.subr.bf16.mxu0 %v1407_v24 }
  0xdc   :  { %1055 = vmatpush3.bf16.msra.mxu0 %v1146_v48 }
  0xdd   :  { %1066 = vmatprep.subr.bf16.mxu0 %v1407_v24 }
 0x192   :  { %v247_v37 = vpop.f32.mrb[0].mxu0 }
 0x193   :  { %v248_v38 = vadd.f32 %v247_v37, %v182_v35  ;;  %v249_v39 = vpop.f32.mrb[1].mxu0 }
 0x194   :  { %v250_v40 = vadd.f32 %v249_v39, %v186_v36  ;;  %v251_v41 = vpop.f32.mrb[2].mxu0 }
 0x195   :  { %v254_v42 = vmax.f32 %v248_v38, 0.0  ;;  %v252_v43 = vpop.f32.mrb[3].mxu0  ;;  %v981_v38 = vld [vmem:[#allocation11] ss:$0 sm:$0xff] }
 0x196   :  { %v255_v44 = vmax.f32 %v250_v40, 0.0 }
 0x197   :  { %v256_v46 = vpack.c.bf16 %v254_v42, %v254_v42 }
 0x198   :  { %v257_v45 = vpack.c.bf16 %v255_v44, %v255_v44 }
 0x19a   :  { %425 = vmatprep.mubr.bf16.mxu1 %v257_v45 }
 0x19b   :  { %426 = vmatmul.mubr.bf16.vlgmr.msra.gmra.mrb[0].mxu1 %v256_v46 }
 0x19c   :  { %1062 = vmatprep.mubr.msk.bf16.mxu1 %vm1408_vm1, %v1407_v24  ;;  %1061 = vmatpush3.bf16.msra.mxu1 %v1149_v49  ;;  %v1155_v49 = vld [vmem:[#allocation14] sm:$0xff]  }
 0x19d   :  { %1076 = vmatprep.subr.bf16.mxu1 %v1407_v24 }
 0x26e   :  { %v1010_v50 = vpop.f32.mrb[0].mxu1 }
 0x26f   :  { %v1011_v52 = vpop.f32.mrb[1].mxu1 }
 0x270   :  { %v1012_v53 = vadd.f32 %v1011_v52, %v1010_v50  ;;  %v1013_v54 = vpop.f32.mrb[2].mxu1 }
 0x271   :  { %v1014_v55 = vpop.f32.mrb[3].mxu1 }
 0x272   :  { %v428_v56 = vadd.f32 %v1012_v53, %v948_v51  ;;  %v1156_v51 = vld [vmem:[#allocation14 + $0x8] sm:$0xff]  }
 0x274   :  { %v433_v57 = vmax.f32 %v428_v56, 0.0 }
 0x276   :  { %v434_v59 = vpack.c.bf16 %v433_v57, %v433_v57 }
 0x278   :  { %1057 = vmatmul.mubr.bf16.vlgmr.msra.gmra.mrb[4].mxu0 %v434_v59 }
 0x279   :  { %1067 = vmatpush3.bf16.msra.mxu0 %v1147_v58  ;;  %1072 = vmatprep.mubr.msk.bf16.mxu0 %vm1408_vm1, %v1407_v24 }
 0x27a   :  { %1068 = vmatprep.subr.bf16.mxu0 %v1407_v24 }
 0x27d   :  { %1069 = vmatpush3.bf16.msra.mxu0 %v1148_v60 }
 0x27e   :  { %1070 = vmatprep.subr.bf16.mxu0 %v1407_v24 }
 0x281   :  { %1071 = vmatpush3.bf16.msra.mxu0 %v627_v62 }
 0x282   :  { %1092 = vmatprep.subr.bf16.mxu0 %v1407_v24 }
 0x284   :  { %1073 = vmatmul.mubr.msk.bf16.vlgmr.msra.gmra.mrb[8].mxu0 %vm621_vm3, %v547_v0 }
 0x285   :  { %1096 = vmatprep.mubr.msk.bf16.mxu0 %vm1408_vm1, %v1407_v24  ;;  %1093 = vmatpush3.bf16.msra.mxu0 %v1155_v49 }
 0x286   :  { %1094 = vmatprep.subr.bf16.mxu0 %v1407_v24 }
 0x289   :  { %1095 = vmatpush3.bf16.msra.mxu0 %v1156_v51 }
 0x34b   :  { %v540_v2 = vpop.f32.mrb[4].mxu0 }
 0x34c   :  { %v541_v3 = vadd.f32 %v965_v1, %v540_v2  ;;  %v1058_v4 = vpop.f32.mrb[5].mxu0 }
 0x34d   :  { %v543_v5 = vpop.f32.mrb[6].mxu0 }
 0x34e   :  { %v553_v6 = vpack.c.bf16 %v541_v3, %v541_v3  ;;  %v1059_v7 = vpop.f32.mrb[7].mxu0 }
 0x350   :  { %1063 = vmatmul.mubr.msk.bf16.vlgmr.msra.gmra.mrb[4].mxu1 %vm562_vm4, %v553_v6 }
 0x351   :  { %1080 = vmatprep.mubr.msk.bf16.mxu1 %vm1408_vm1, %v1407_v24  ;;  %1077 = vmatpush3.bf16.msra.mxu1 %v1151_v12 }
 0x352   :  { %1078 = vmatprep.subr.bf16.mxu1 %v1407_v24 }
 0x355   :  { %1079 = vmatpush3.bf16.msra.mxu1 %v1152_v13 }
 0x356   :  { %1084 = vmatprep.subr.bf16.mxu1 %v1407_v24 }
 0x357   :  { %v663_v8 = vpop.f32.mrb[8].mxu0 }
 0x358   :  { %v1074_v9 = vpop.f32.mrb[9].mxu0 }
 0x359   :  { %v666_v10 = vpop.f32.mrb[10].mxu0 }
 0x35a   :  { %v1075_v11 = vpop.f32.mrb[11].mxu0 }
 0x423   :  { %v600_v14 = vpop.f32.mrb[4].mxu1 }
 0x424   :  { %v664_v16 = vadd.f32 %v663_v8, %v600_v14  ;;  %v1064_v17 = vpop.f32.mrb[5].mxu1 }
 0x425   :  { %v603_v18 = vpop.f32.mrb[6].mxu1 }
 0x426   :  { %v676_v19 = vadd.f32 %v980_v15, %v664_v16  ;;  %v1065_v20 = vpop.f32.mrb[7].mxu1 }
 0x428   :  { %v677_v21 = vmax.f32 %v676_v19, 0.0 }
 0x42a   :  { %v679_v23 = vpack.c.bf16 %v677_v21, %v677_v21 }
 0x42c   :  { %1081 = vmatmul.mubr.msk.bf16.vlgmr.msra.gmra.mrb[8].mxu1 %vm209_vm0, %v679_v23 }
 0x42d   :  { %1085 = vmatpush3.bf16.msra.mxu1 %v1153_v22  ;;  %1088 = vmatprep.mubr.msk.bf16.mxu1 %vm1408_vm1, %v1407_v24 }
 0x42e   :  { %1086 = vmatprep.subr.bf16.mxu1 %v1407_v24 }
 0x431   :  { %1087 = vmatpush3.bf16.msra.mxu1 %v1154_v25 }
 0x434   :  { %1089 = vmatmul.mubr.msk.bf16.vlgmr.msra.gmra.mrb[12].mxu1 %vm209_vm0, %v746_v27 }
 0x4ff   :  { %v740_v28 = vpop.f32.mrb[8].mxu1 }
 0x500   :  { %v1082_v29 = vpop.f32.mrb[9].mxu1  ;;  %v741_v39 = vadd.f32 %v981_v38, %v740_v28 }
 0x501   :  { %v743_v30 = vpop.f32.mrb[10].mxu1 }
 0x502   :  { %v1083_v31 = vpop.f32.mrb[11].mxu1 }
 0x507   :  { %v807_v33 = vpop.f32.mrb[12].mxu1 }
 0x508   :  { %v808_v34 = vadd.f32 %v985_v32, %v807_v33  ;;  %v1090_v35 = vpop.f32.mrb[13].mxu1 }
 0x509   :  { %v810_v36 = vpop.f32.mrb[14].mxu1 }
 0x50a   :  { %821 = vrot.lane.b32.xlu0 %v808_v34, %s1397_s6  ;;  %v1091_v37 = vpop.f32.mrb[15].mxu1  ;;  %v813_v40 = vadd.f32 %v808_v34, %v741_v39 }
 0x50c   :  { %v989_v41 = vmul.f32 -1.442695, %v813_v40 }
 0x50e   :  { %1157 = vpow2.f32 %v989_v41 }
 0x518   :  { %v1158_v42 = vpop.eup %1157 }
 0x519   :  { %v817_v43 = vadd.f32 1.0, %v1158_v42 }
 0x51b   :  { %1159 = vrcp.f32 %v817_v43 }
 0x525   :  { %v1160_v44 = vpop.eup %1159 }
 0x526   :  { %v831_v53 = vsub.f32 1.0, %v1160_v44 }
 0x57c   :  { %v822_v45 = vpop.permute.xlu0 %821 }
 0x57d   :  { %v824_v46 = vmul.f32 %v1160_v44, %v822_v45 }
 0x57f   :  { %826 = vrot.lane.b32.xlu0 %v824_v46, %s1397_s6 }
 0x5f1   :  { %v827_v47 = vpop.permute.xlu0 %826 }
 0x5f2   :  { %v829_v48 = vadd.f32 %v827_v47, %v741_v39 }
 0x5f4   :  { %1161 = vtanh.f32 %v829_v48 }
 0x5fe   :  { %v1162_v50 = vpop.eup %1161 }
 0x5ff   :  { %833 = vrot.lane.b32.xlu1 %v1162_v50, %s1409_s14 }
 0x603   :  { %838 = vrot.lane.b32.xlu1 %v678_v26, %s1410_s11 }
 0x671   :  { %v834_v52 = vpop.permute.xlu1 %833 }
 0x672   :  { %v836_v55 = vmul.f32 %v834_v52, %v831_v53 }
 0x675   :  { %v839_v54 = vpop.permute.xlu1 %838 }
 0x676   :  { %v841_v56 = vmul.f32 %v1160_v44, %v839_v54 }
 0x678   :  { %v842_v57 = vadd.f32 %v841_v56, %v836_v55 }
 0x67a   :  { %915 = vrot.lane.b32.xlu1 %v842_v57, %s1409_s14  ;;  %v843_v58 = vpack.c.bf16 %v842_v57, %v842_v57 }
 0x67c   :  { %856 = vrot.lane.b32.xlu0 %v843_v58, %s1409_s14 }
 0x6ec   :  { %v916_v59 = vpop.permute.xlu1 %915 }
 0x6ed   :  { %v918_v60 = vsel %vm209_vm0, %v916_v59, 0.0 }
 0x6ee   :  { %919 = vst [vmem:[%s1825_s19] sm:$0xff] %v918_v60  ;;  %v857_v24 = vpop.permute.xlu0 %856 }
 0x6ef   :  { %1097 = vmatmul.mubr.msk.bf16.vlgmr.msra.gmra.mrb[12].mxu0 %vm209_vm0, %v857_v24 }
 0x7c2   :  { %v907_v62 = vpop.f32.mrb[12].mxu0 }
 0x7c3   :  { %v908_v63 = vadd.f32 %v990_v61, %v907_v62  ;;  %v1098_v0 = vpop.f32.mrb[13].mxu0 }
 0x7c4   :  { %v910_v1 = vpop.f32.mrb[14].mxu0 }
 0x7c5   :  { %913 = vst [vmem:[#allocation17] sm:$0xff] %v908_v63  ;;  %v1099_v2 = vpop.f32.mrb[15].mxu0 }
 0x7c6   :  { %1372 = shalt.err (!%p1369_p6)
}
 0x7c7   :  { %s1373_s21 = scalar_lea.hbm %s1824_s18, 128 }
 0x7c8   :  { %p1374_p7 = scmp.ne.s32.totalorder %s1824_s18, %s1373_s21  ;;  %p1377_p8 = scmp.lt.u32.totalorder %s1373_s21, %s1824_s18 }
 0x7ca   :  { %p1379_p9 = pnand %p1377_p8, %p1374_p7 }
 0x7cc   :  { %1382 = shalt.err (!%p1379_p9)
}
 0x7cd   :  { %929 = dma.vmem_to_hbm [thread:$0]  %s927_s28, 128, %s1824_s18, [#allocation4]  }
 0x7ce   :  { %1393 = dma.done.wait [#allocation4], 128  }
 0x7cf   :  { %1394 = vsyncadd [#allocation4], 4294967168 }
 0x7d0   :  { %937 = vsyncpa [#allocation3], 1 }
 0x7d1   :  { %938 = vsyncpa [#allocation6], 1 }
 0x7d2   :  { %939 = vsyncpa [#allocation9], 1 }
 0x7d3   :  { %940 = vsyncpa [#allocation12], 1 }
 0x7d4   :  { %941 = vsyncpa [#allocation15], 1 }
 0x7d5   :  { %942 = vsyncpa [#allocation4], 1 }

</bundles_post_ra>
